<compile_context>
chip_gen: v6e
topology: v6e:2x2x1
jax: 0.10.0
libtpu: 0.0.40
codegen_flags: <defaults>
</compile_context>

<pallas_src>
import functools
import math

import jax
import jax.numpy as jnp
from jax.scipy.linalg import solve_triangular
from jax.experimental import pallas as pl
from jax.experimental.pallas import tpu as pltpu


# --------------------------------------------------------------------------
# small parameter / linear-algebra glue (plain JAX, not Pallas)
# --------------------------------------------------------------------------
def glorot_init(key, in_dim, out_dim):
    # mirrors torch glorot_init: U(-r, r) with r = sqrt(6/(in+out))
    init_range = math.sqrt(6.0 / (in_dim + out_dim))
    u = jax.random.uniform(key, (in_dim, out_dim), dtype=jnp.float32)
    return u * 2.0 * init_range - init_range


def ortho_norm(w):
    # W @ inv(L).T with L = chol(W^T W + 1e-4 I); triangular solve instead of
    # an explicit inverse (same math, better conditioned).
    wtw = w.T @ w + 1e-4 * jnp.eye(w.shape[1], dtype=w.dtype)
    L = jnp.linalg.cholesky(wtw)
    return solve_triangular(L, w.T, lower=True).T


def _round_up(x, m):
    return ((x + m - 1) // m) * m


# --------------------------------------------------------------------------
# one GraphConvolution layer, tiled over (row tiles, contraction tiles)
# --------------------------------------------------------------------------
def _gc_layer_kernel(adj_ref, xk_ref, xr_ref, w_ref, o_ref, acc_ref, *,
                     theta, alpha, mode, nclass):
    """One GCNII GraphConvolution (variant=False, residual=False, act=tanh).

    mode == "relu"        : o = relu(tanh(out))            (layer 1, bf16 out)
    mode == "log_softmax" : o = log_softmax(tanh(out))[:, :nclass masked]
                                                            (layer 2, f32 out)
    Grid: (rows "parallel", adjacency-contraction "arbitrary").
    """
    k = pl.program_id(1)

    @pl.when(k == 0)
    def _():
        acc_ref[...] = jnp.zeros_like(acc_ref)

    # hi += adj_tile @ x_tile   (bf16 operands, f32 MXU accumulation)
    acc_ref[...] += jnp.dot(adj_ref[...], xk_ref[...],
                            preferred_element_type=jnp.float32)

    @pl.when(k == pl.num_programs(1) - 1)
    def _():
        hi = acc_ref[...]
        # variant=False: support = (1-alpha)*hi + alpha*h0 ; r = support
        support = (1.0 - alpha) * hi + alpha * xr_ref[...].astype(jnp.float32)
        out = theta * jnp.dot(support.astype(jnp.bfloat16), w_ref[...],
                              preferred_element_type=jnp.float32) \
              + (1.0 - theta) * support
        out = jnp.tanh(out)                       # activation = torch.tanh

        if mode == "relu":
            o_ref[...] = jnp.maximum(out, 0.0).astype(o_ref.dtype)
        else:
            # log_softmax over the real class columns only (padded lanes masked)
            lane = jax.lax.broadcasted_iota(jnp.int32, out.shape, 1)
            masked = jnp.where(lane < nclass, out, jnp.float32(-1e30))
            m = jnp.max(masked, axis=-1, keepdims=True)
            s = masked - m
            lse = jnp.log(jnp.sum(jnp.exp(s), axis=-1, keepdims=True))
            o_ref[...] = (s - lse).astype(o_ref.dtype)


def _gc_layer(adj_p, x_p, w_p, *, theta, alpha, mode, nclass,
              tile_m, tile_k, out_dtype):
    n_p = adj_p.shape[0]
    f_p = x_p.shape[1]
    grid = (n_p // tile_m, n_p // tile_k)

    out_bytes = 2 if out_dtype == jnp.bfloat16 else 4
    flops = 2 * n_p * n_p * f_p + 2 * n_p * f_p * f_p
    bytes_accessed = (n_p * n_p + 2 * n_p * f_p + f_p * f_p) * 2 \
                     + n_p * f_p * out_bytes
    transcendentals = n_p * f_p * (1 if mode == "relu" else 3)

    # VMEM budget: double-buffered operand tiles + output tile + f32 accumulator
    # (+ headroom for compiler temporaries), clamped to a limit that is safe on
    # v5e / v6e (128 MiB) and v7x (64 MiB physical per TC).
    tiles_bytes = (2 * (tile_m * tile_k * 2      # adj tile (bf16)
                        + tile_k * f_p * 2       # x contraction tile (bf16)
                        + tile_m * f_p * 2       # x residual tile (bf16)
                        + f_p * f_p * 2          # ortho weight (bf16)
                        + tile_m * f_p * out_bytes)   # output tile
                   + tile_m * f_p * 4)           # accumulator scratch
    vmem_limit = int(min(max(4 * tiles_bytes, 8 << 20), 48 << 20))

    kernel = functools.partial(_gc_layer_kernel, theta=theta, alpha=alpha,
                               mode=mode, nclass=nclass)

    return pl.pallas_call(
        kernel,
        out_shape=jax.ShapeDtypeStruct((n_p, f_p), out_dtype),
        grid=grid,
        in_specs=[
            pl.BlockSpec((tile_m, tile_k), lambda i, k: (i, k)),  # adj tile
            pl.BlockSpec((tile_k, f_p), lambda i, k: (k, 0)),     # x contraction rows
            pl.BlockSpec((tile_m, f_p), lambda i, k: (i, 0)),     # x residual rows (h0)
            pl.BlockSpec((f_p, f_p), lambda i, k: (0, 0)),        # ortho weight
        ],
        out_specs=pl.BlockSpec((tile_m, f_p), lambda i, k: (i, 0)),
        scratch_shapes=[pltpu.VMEM((tile_m, f_p), jnp.float32)],
        compiler_params=pltpu.CompilerParams(
            dimension_semantics=("parallel", "arbitrary"),
            vmem_limit_bytes=vmem_limit),
        cost_estimate=pl.CostEstimate(flops=flops,
                                      transcendentals=transcendentals,
                                      bytes_accessed=bytes_accessed),
    )(adj_p, x_p, x_p, w_p)


# --------------------------------------------------------------------------
# full forward: gc1 + relu  ->  gc2 + log_softmax
# --------------------------------------------------------------------------
def gcn_forward(adj, x, w1_ortho, w2_ortho, *, lamda, alpha, nclass):
    n, f_in = x.shape
    nhidden = w1_ortho.shape[1]
    f_out = w2_ortho.shape[1]

    # The (1-theta)*support residual mix requires in_features == out_features
    # in both layers, so one common padded feature width covers every operand
    # (and the nclass-wide output slab coincides with it).
    f_p = _round_up(max(f_in, nhidden, f_out), 128)

    # Row / contraction tiling.  256x512 adj tiles (K 256-aligned for the
    # v6e/v7x MXU); tiny graphs collapse to a single tile per axis.
    # NOTE: for the tiny demo shape this call is dispatch-overhead dominated;
    # the tiling only pays off at realistic graph sizes.
    n_p = _round_up(n, 128)
    if n_p >= 512:
        n_p = _round_up(n_p, 512)
        tile_m, tile_k = 256, 512
    else:
        tile_m = tile_k = n_p

    def pad2(a, rows, cols, dtype):
        out = jnp.zeros((rows, cols), dtype)
        return out.at[:a.shape[0], :a.shape[1]].set(a.astype(dtype))

    adj_p = pad2(adj, n_p, n_p, jnp.bfloat16)
    x_p = pad2(x, n_p, f_p, jnp.bfloat16)
    w1_p = pad2(w1_ortho, f_p, f_p, jnp.bfloat16)
    w2_p = pad2(w2_ortho, f_p, f_p, jnp.bfloat16)

    theta1 = math.log(lamda / 1.0 + 1.0)
    theta2 = math.log(lamda / 2.0 + 1.0)

    # Layer 1: gc1 (tanh) + F.relu -> h kept as bf16 in HBM between the two
    # pipelined passes (h traffic is negligible vs. the two N^2 adj reads).
    h_p = _gc_layer(adj_p, x_p, w1_p, theta=theta1, alpha=alpha, mode="relu",
                    nclass=nclass, tile_m=tile_m, tile_k=tile_k,
                    out_dtype=jnp.bfloat16)
    # TODO(synk): F.dropout omitted (inference/identity semantics; no torch-RNG match).

    # Layer 2: gc2 (tanh) + masked log_softmax over the real class columns.
    out_p = _gc_layer(adj_p, h_p, w2_p, theta=theta2, alpha=alpha,
                      mode="log_softmax", nclass=nclass, tile_m=tile_m,
                      tile_k=tile_k, out_dtype=jnp.float32)

    return out_p[:n, :nclass]


# --------------------------------------------------------------------------
# model wrapper
# --------------------------------------------------------------------------
class GCN:
    """JAX/Pallas port of the reference GCN (two GraphConvolution layers)."""

    def __init__(self, nfeat, nhidden, nclass, dropout, key):
        nfeat_j = None
        for ij in range(len(nfeat)):       # reference takes the last entry of nfeat
            nfeat_j = nfeat[ij]
        k1, k2 = jax.random.split(key)
        # glorot_init overrides reset_parameters() in the reference too.
        self.w1 = glorot_init(k1, nfeat_j, nhidden)
        self.w2 = glorot_init(k2, nhidden, nclass)
        self.nclass = nclass
        self.dropout = dropout
        # GraphConvolution defaults: residual=False, variant=False, activation=tanh.

    def __call__(self, x, adj, *, lamda=0.5, alpha=0.1):
        # TODO(synk): reference GCN.forward calls gc1(x, adj) without the required
        # (h0, lamda, alpha, l) args (would raise in PyTorch); we use h0 = each
        # layer's own input with fixed lamda/alpha and l = layer index.
        w1o = ortho_norm(self.w1)
        w2o = ortho_norm(self.w2)
        return gcn_forward(adj, x, w1o, w2o,
                           lamda=lamda, alpha=alpha, nclass=self.nclass)


if __name__ == "__main__":
    key = jax.random.PRNGKey(0)
    kx, ka, kp = jax.random.split(key, 3)

    N = 16           # number of graph nodes
    NFEAT = [32]     # module receives a list of feature dims, uses the last one
    NHID = 32        # (1-theta)*r residual mix requires in_features == out_features,
    NCLASS = 32      # so all dims match.

    x = jax.random.normal(kx, (N, NFEAT[-1]), dtype=jnp.float32)
    a = jax.random.uniform(ka, (N, N), dtype=jnp.float32)
    adj = (a + a.T) * 0.5                                   # symmetric dense adjacency
    adj = adj / jnp.sum(adj, axis=1, keepdims=True)         # row-normalized

    model = GCN(NFEAT, NHID, NCLASS, dropout=0.5, key=kp)
    out = model(x, adj)
    jax.block_until_ready(out)
    assert out.shape == (N, NCLASS) and out.dtype == jnp.float32
    assert bool(jnp.all(jnp.isfinite(out)))
    print("KERNEL_OK")
</pallas_src>

<mosaic_0001>
module attributes {stable_mosaic.version = 11 : i64} {
  func.func @_gc_layer_kernel(%arg0: i32, %arg1: i32, %arg2: memref<128x128xbf16, #tpu.memory_space<vmem>>, %arg3: memref<128x128xbf16, #tpu.memory_space<vmem>>, %arg4: memref<128x128xbf16, #tpu.memory_space<vmem>>, %arg5: memref<128x128xbf16, #tpu.memory_space<vmem>>, %arg6: memref<128x128xbf16, #tpu.memory_space<vmem>>, %arg7: memref<128x128xf32, #tpu.memory_space<vmem>>) attributes {dimension_semantics = [#tpu.dimension_semantics<parallel>, #tpu.dimension_semantics<arbitrary>], iteration_bounds = array<i64: 1, 1>, scalar_prefetch = 0 : i64, scratch_operands = 1 : i64, tpu.core_type = #tpu.core_type<tc>, window_params = [{transform_indices = @transform_0, window_bounds = array<i64: 128, 128>}, {transform_indices = @transform_1, window_bounds = array<i64: 128, 128>}, {transform_indices = @transform_2, window_bounds = array<i64: 128, 128>}, {pipeline_mode = #tpu.pipeline_mode<synchronous>, transform_indices = @transform_3, window_bounds = array<i64: 128, 128>}, {transform_indices = @transform_4, window_bounds = array<i64: 128, 128>}]} {
    %c0_i32 = arith.constant 0 : i32
    %0 = arith.cmpi eq, %arg1, %c0_i32 : i32
    %1 = arith.extui %0 : i1 to i32
    %c0_i32_0 = arith.constant 0 : i32
    %2 = arith.cmpi ne, %1, %c0_i32_0 : i32
    scf.if %2 {
      %cst_10 = arith.constant 0.000000e+00 : f32
      %12 = vector.broadcast %cst_10 : f32 to vector<128x128xf32>
      %c0_11 = arith.constant 0 : index
      %c0_12 = arith.constant 0 : index
      %13 = vector.load %arg7[%c0_11, %c0_12] : memref<128x128xf32, #tpu.memory_space<vmem>>, vector<128x128xf32>
      tpu.vector_store %arg7[%c0_11, %c0_12], %12 {strides = array<i32>} : memref<128x128xf32, #tpu.memory_space<vmem>>, vector<128x128xf32>,
    } else {
    }
    %c0 = arith.constant 0 : index
    %c0_1 = arith.constant 0 : index
    %3 = vector.load %arg7[%c0, %c0_1] : memref<128x128xf32, #tpu.memory_space<vmem>>, vector<128x128xf32>
    %c0_2 = arith.constant 0 : index
    %c0_3 = arith.constant 0 : index
    %4 = vector.load %arg2[%c0_2, %c0_3] : memref<128x128xbf16, #tpu.memory_space<vmem>>, vector<128x128xbf16>
    %c0_4 = arith.constant 0 : index
    %c0_5 = arith.constant 0 : index
    %5 = vector.load %arg3[%c0_4, %c0_5] : memref<128x128xbf16, #tpu.memory_space<vmem>>, vector<128x128xbf16>
    %cst = arith.constant dense<0.000000e+00> : vector<128x128xf32>
    %6 = tpu.matmul %4, %5, %cst {dimension_numbers = #tpu.dot_dimension_numbers<[1], [0], [0], [1], [0, 0, 1, 1], [], []>} : vector<128x128xbf16>, vector<128x128xbf16>, vector<128x128xf32> -> vector<128x128xf32>
    %7 = arith.addf %3, %6 : vector<128x128xf32>
    %c0_6 = arith.constant 0 : index
    %c0_7 = arith.constant 0 : index
    %8 = vector.load %arg7[%c0_6, %c0_7] : memref<128x128xf32, #tpu.memory_space<vmem>>, vector<128x128xf32>
    tpu.vector_store %arg7[%c0_6, %c0_7], %7 {strides = array<i32>} : memref<128x128xf32, #tpu.memory_space<vmem>>, vector<128x128xf32>,
    %c0_i32_8 = arith.constant 0 : i32
    %9 = arith.cmpi eq, %arg1, %c0_i32_8 : i32
    %10 = arith.extui %9 : i1 to i32
    %c0_i32_9 = arith.constant 0 : i32
    %11 = arith.cmpi ne, %10, %c0_i32_9 : i32
    scf.if %11 {
      %c0_10 = arith.constant 0 : index
      %c0_11 = arith.constant 0 : index
      %12 = vector.load %arg7[%c0_10, %c0_11] : memref<128x128xf32, #tpu.memory_space<vmem>>, vector<128x128xf32>
      %cst_12 = arith.constant 0.899999976 : f32
      %13 = vector.broadcast %cst_12 : f32 to vector<128x128xf32>
      %14 = arith.mulf %13, %12 : vector<128x128xf32>
      %c0_13 = arith.constant 0 : index
      %c0_14 = arith.constant 0 : index
      %15 = vector.load %arg4[%c0_13, %c0_14] : memref<128x128xbf16, #tpu.memory_space<vmem>>, vector<128x128xbf16>
      %16 = arith.extf %15 : vector<128x128xbf16> to vector<128x128xf32>
      %cst_15 = arith.constant 1.000000e-01 : f32
      %17 = vector.broadcast %cst_15 : f32 to vector<128x128xf32>
      %18 = arith.mulf %17, %16 : vector<128x128xf32>
      %19 = arith.addf %14, %18 : vector<128x128xf32>
      %20 = arith.truncf %19 : vector<128x128xf32> to vector<128x128xbf16>
      %c0_16 = arith.constant 0 : index
      %c0_17 = arith.constant 0 : index
      %21 = vector.load %arg5[%c0_16, %c0_17] : memref<128x128xbf16, #tpu.memory_space<vmem>>, vector<128x128xbf16>
      %cst_18 = arith.constant dense<0.000000e+00> : vector<128x128xf32>
      %22 = tpu.matmul %20, %21, %cst_18 {dimension_numbers = #tpu.dot_dimension_numbers<[1], [0], [0], [1], [0, 0, 1, 1], [], []>} : vector<128x128xbf16>, vector<128x128xbf16>, vector<128x128xf32> -> vector<128x128xf32>
      %cst_19 = arith.constant 0.405465096 : f32
      %23 = vector.broadcast %cst_19 : f32 to vector<128x128xf32>
      %24 = arith.mulf %23, %22 : vector<128x128xf32>
      %cst_20 = arith.constant 0.594534874 : f32
      %25 = vector.broadcast %cst_20 : f32 to vector<128x128xf32>
      %26 = arith.mulf %25, %19 : vector<128x128xf32>
      %27 = arith.addf %24, %26 : vector<128x128xf32>
      %28 = math.tanh %27 : vector<128x128xf32>
      %cst_21 = arith.constant 0.000000e+00 : f32
      %29 = vector.broadcast %cst_21 : f32 to vector<128x128xf32>
      %30 = arith.maximumf %28, %29 : vector<128x128xf32>
      %31 = arith.truncf %30 : vector<128x128xf32> to vector<128x128xbf16>
      %c0_22 = arith.constant 0 : index
      %c0_23 = arith.constant 0 : index
      %32 = vector.load %arg6[%c0_22, %c0_23] : memref<128x128xbf16, #tpu.memory_space<vmem>>, vector<128x128xbf16>
      tpu.vector_store %arg6[%c0_22, %c0_23], %31 {strides = array<i32>} : memref<128x128xbf16, #tpu.memory_space<vmem>>, vector<128x128xbf16>,
    } else {
    }
    return
  }
  func.func @transform_0(%arg0: i32, %arg1: i32) -> (i32, i32) {
    %c0_i32 = arith.constant 0 : i32
    return %arg0, %arg1 : i32, i32
  }
  func.func @transform_1(%arg0: i32, %arg1: i32) -> (i32, i32) {
    %c0_i32 = arith.constant 0 : i32
    %c0_i32_0 = arith.constant 0 : i32
    return %arg1, %c0_i32 : i32, i32
  }
  func.func @transform_2(%arg0: i32, %arg1: i32) -> (i32, i32) {
    %c0_i32 = arith.constant 0 : i32
    %c0_i32_0 = arith.constant 0 : i32
    return %arg0, %c0_i32 : i32, i32
  }
  func.func @transform_3(%arg0: i32, %arg1: i32) -> (i32, i32) {
    %c0_i32 = arith.constant 0 : i32
    %c0_i32_0 = arith.constant 0 : i32
    %c0_i32_1 = arith.constant 0 : i32
    return %c0_i32, %c0_i32_0 : i32, i32
  }
  func.func @transform_4(%arg0: i32, %arg1: i32) -> (i32, i32) {
    %c0_i32 = arith.constant 0 : i32
    %c0_i32_0 = arith.constant 0 : i32
    return %arg0, %c0_i32 : i32, i32
  }
}

</mosaic_0001>

<bundles_post_ra>
// kernel: tpu_custom_call.1
= control target key start
LH: loop header
LB: loop body
LE: loop exit
PB: predicated region body
PF: predicated region fallthrough
CT: control target
= control target key end

     0   :  { %9 = vsyncpa [#allocation4], 0  ;;  %s1349_s0 = inlined_call_operand.hbm [shape: bf16[128,128], index: 0, kind: input, shape index: {}]   ;;  %s1350_s1 = inlined_call_operand.hbm [shape: bf16[128,128], index: 1, kind: input, shape index: {}]   ;;  %s1351_s2 = inlined_call_operand.hbm [shape: bf16[128,128], index: 2, kind: input, shape index: {}]   ;;  %s1352_s3 = inlined_call_operand.hbm [shape: bf16[128,128], index: 3, kind: input, shape index: {}]   ;;  %s1353_s4 = inlined_call_operand.hbm [shape: bf16[128,128], index: 4, kind: output, shape index: {}]  }
   0x1   :  { %10 = vsyncpa [#allocation7], 0 }
   0x2   :  { %11 = vsyncpa [#allocation10], 0 }
   0x3   :  { %12 = vsyncpa [#allocation5], 0  ;;  %s1223_s15 = smov [#allocation6]   ;;  %s1224_s17 = smov [#allocation3]  }
   0x4   :  { %s30_s16 = sshll.u32 %s1223_s15, 4  ;;  %s18_s18 = sshll.u32 %s1224_s17, 4  ;;  %s31_s16 = int_to_ptr.vmem [resolvable:$true] %s30_s16  ;;  %s19_s18 = int_to_ptr.vmem [resolvable:$true] %s18_s18 }
   0x5   :  { %s1123_s19 = scalar_lea.vmem %s31_s16, 1024  ;;  %p1128_p1 = scmp.lt.s32.totalorder %s31_s16, %s31_s16 }
   0x6   :  { %p1124_p0 = scmp.ne.s32.totalorder %s31_s16, %s1123_s19  ;;  %p1129_p2 = scmp.lt.s32.totalorder %s1123_s19, %s1123_s19 }
   0x8   :  { %p1130_p3 = por %p1129_p2, %p1128_p1 }
   0xa   :  { %p1131_p4 = pnand %p1130_p3, %p1124_p0 }
   0xc   :  { %1134 = shalt.err (!%p1131_p4)
}
   0xd   :  { %s1225_s20 = smov 64   ;;  %s1226_s21 = smov 4  }
   0xe   :  { %36 = dma.hbm_to_vmem [thread:$0]  %s1350_s1, 1024, %s31_s16, [#allocation7], %s1225_s20, %s1225_s20, %s1226_s21  }
   0xf   :  { %s1143_s24 = scalar_lea.vmem %s19_s18, 1024  ;;  %p1148_p6 = scmp.lt.s32.totalorder %s19_s18, %s19_s18 }
  0x10   :  { %p1144_p5 = scmp.ne.s32.totalorder %s19_s18, %s1143_s24  ;;  %p1149_p7 = scmp.lt.s32.totalorder %s1143_s24, %s1143_s24 }
  0x12   :  { %p1150_p8 = por %p1149_p7, %p1148_p6 }
  0x14   :  { %p1151_p9 = pnand %p1150_p8, %p1144_p5 }
  0x16   :  { %1154 = shalt.err (!%p1151_p9)
}
  0x17   :  { %24 = dma.hbm_to_vmem [thread:$0]  %s1349_s0, 1024, %s19_s18, [#allocation4], %s1225_s20, %s1225_s20, %s1226_s21  }
  0x18   :  { %s1227_s27 = smov [#allocation8]   ;;  %s1228_s29 = smov [#allocation9]  }
  0x19   :  { %s42_s28 = sshll.u32 %s1227_s27, 4  ;;  %s54_s30 = sshll.u32 %s1228_s29, 4  ;;  %s43_s28 = int_to_ptr.vmem [resolvable:$true] %s42_s28  ;;  %s55_s30 = int_to_ptr.vmem [resolvable:$true] %s54_s30 }
  0x1a   :  { %s1163_s1 = scalar_lea.vmem %s43_s28, 1024  ;;  %p1168_p11 = scmp.lt.s32.totalorder %s43_s28, %s43_s28 }
  0x1b   :  { %p1164_p10 = scmp.ne.s32.totalorder %s43_s28, %s1163_s1  ;;  %p1169_p12 = scmp.lt.s32.totalorder %s1163_s1, %s1163_s1 }
  0x1d   :  { %p1170_p13 = por %p1169_p12, %p1168_p11 }
  0x1f   :  { %p1171_p0 = pnand %p1170_p13, %p1164_p10 }
  0x21   :  { %1174 = shalt.err (!%p1171_p0)
}
  0x22   :  { %48 = dma.hbm_to_vmem [thread:$0]  %s1351_s2, 1024, %s43_s28, [#allocation7], %s1225_s20, %s1225_s20, %s1226_s21  }
  0x23   :  { %s1183_s0 = scalar_lea.vmem %s55_s30, 1024  ;;  %p1188_p2 = scmp.lt.s32.totalorder %s55_s30, %s55_s30 }
  0x24   :  { %p1184_p1 = scmp.ne.s32.totalorder %s55_s30, %s1183_s0  ;;  %p1189_p3 = scmp.lt.s32.totalorder %s1183_s0, %s1183_s0 }
  0x26   :  { %p1190_p4 = por %p1189_p3, %p1188_p2 }
  0x28   :  { %p1191_p5 = pnand %p1190_p4, %p1184_p1 }
  0x2a   :  { %1194 = shalt.err (!%p1191_p5)
}
  0x2b   :  { %60 = dma.hbm_to_vmem [thread:$0]  %s1352_s3, 1024, %s55_s30, [#allocation10], %s1225_s20, %s1225_s20, %s1226_s21  }
  0x2c   :  { %1215 = dma.done.wait [#allocation4], 1024  }
  0x2d   :  { %1216 = vsyncadd [#allocation4], 4294966272 }
  0x2e   :  { %1217 = dma.done.wait [#allocation7], 2048  }
  0x2f   :  { %1218 = vsyncadd [#allocation7], 4294965248 }
  0x30   :  { %1219 = dma.done.wait [#allocation10], 1024  }
  0x31   :  { %1220 = vsyncadd [#allocation10], 4294966272  ;;  %v1059_v0 = vld [vmem:[#allocation6 + $0x38] sm:$0xff]   ;;  %v1060_v1 = vld [vmem:[#allocation6 + $0x30] sm:$0xff]   ;;  %s1229_s2 = smov [#allocation11]  }
  0x32   :  { %988 = vmatprep.subr.bf16.mxu0 %v1059_v0  ;;  %v1061_v2 = vld [vmem:[#allocation6 + $0x28] sm:$0xff]   ;;  %v1062_v3 = vld [vmem:[#allocation6 + $0x20] sm:$0xff]   ;;  %v1063_v5 = vld [vmem:[#allocation6 + $0x18] sm:$0xff]   ;;  %s800_s3 = sshll.u32 %s1229_s2, 4  ;;  %s801_s3 = int_to_ptr.vmem [resolvable:$true] %s800_s3 }
  0x33   :  { %989 = vmatpush3.bf16.msra.mxu0 %v1059_v0  ;;  %v1067_v4 = vld [vmem:[#allocation3] sm:$0xff]   ;;  %v1064_v6 = vld [vmem:[#allocation6 + $0x10] sm:$0xff]   ;;  %v1075_v7 = vld [vmem:[#allocation9 + $0x38] sm:$0xff]   ;;  %s1195_s9 = scalar_lea.vmem %s801_s3, 1024  ;;  %p1200_p7 = scmp.lt.s32.totalorder %s801_s3, %s801_s3 }
  0x34   :  { %990 = vmatprep.subr.bf16.mxu0 %v1060_v1  ;;  %1004 = vmatprep.mubr.bf16.mxu0 %v1067_v4  ;;  %v1076_v8 = vld [vmem:[#allocation9 + $0x30] sm:$0xff]   ;;  %v1065_v9 = vld [vmem:[#allocation6 + $0x8] sm:$0xff]   ;;  %v1066_v11 = vld [vmem:[#allocation6] sm:$0xff]   ;;  %p1196_p6 = scmp.ne.s32.totalorder %s801_s3, %s1195_s9  ;;  %p1201_p8 = scmp.lt.s32.totalorder %s1195_s9, %s1195_s9 }
  0x35   :  { %1020 = vmatprep.subr.bf16.mxu1 %v1075_v7  ;;  %v1077_v10 = vld [vmem:[#allocation9 + $0x28] sm:$0xff]   ;;  %v1078_v12 = vld [vmem:[#allocation9 + $0x20] sm:$0xff]   ;;  %v1079_v13 = vld [vmem:[#allocation9 + $0x18] sm:$0xff]  }
  0x36   :  { %1021 = vmatpush3.bf16.msra.mxu1 %v1075_v7  ;;  %v1068_v14 = vld [vmem:[#allocation3 + $0x8] sm:$0xff]   ;;  %v1069_v15 = vld [vmem:[#allocation3 + $0x10] sm:$0xff]   ;;  %v1070_v16 = vld [vmem:[#allocation3 + $0x18] sm:$0xff]   ;;  %p1202_p9 = por %p1201_p8, %p1200_p7 }
  0x37   :  { %991 = vmatpush3.bf16.msra.mxu0 %v1060_v1  ;;  %1022 = vmatprep.subr.bf16.mxu1 %v1076_v8  ;;  %v1071_v17 = vld [vmem:[#allocation3 + $0x20] sm:$0xff]   ;;  %v1072_v18 = vld [vmem:[#allocation3 + $0x28] sm:$0xff]   ;;  %v1073_v19 = vld [vmem:[#allocation3 + $0x30] sm:$0xff]  }
  0x38   :  { %992 = vmatprep.subr.bf16.mxu0 %v1061_v2  ;;  %v1074_v20 = vld [vmem:[#allocation3 + $0x38] sm:$0xff]   ;;  %v1080_v21 = vld [vmem:[#allocation9 + $0x10] sm:$0xff]   ;;  %v1081_v22 = vld [vmem:[#allocation9 + $0x8] sm:$0xff]   ;;  %p1203_p10 = pnand %p1202_p9, %p1196_p6 }
  0x39   :  { %v1082_v23 = vld [vmem:[#allocation9] sm:$0xff]   ;;  %v942_v25 = vld [vmem:[#allocation8 + $0x8] sm:$0xff]   ;;  %v943_v38 = vld [vmem:[#allocation8 + $0x10] sm:$0xff]  }
  0x3a   :  { %1023 = vmatpush3.bf16.msra.mxu1 %v1076_v8  ;;  %v871_v24 = vld [vmem:[#allocation8] sm:$0xff]   ;;  %v877_v27 = vunpack.c.h.bf16 %v942_v25  ;;  %v876_v30 = vunpack.c.l.bf16 %v942_v25  ;;  %v944_v43 = vld [vmem:[#allocation8 + $0x18] sm:$0xff]   ;;  %v880_v46 = vunpack.c.l.bf16 %v943_v38  ;;  %v881_v48 = vunpack.c.h.bf16 %v943_v38 }
  0x3b   :  { %993 = vmatpush3.bf16.msra.mxu0 %v1061_v2  ;;  %1024 = vmatprep.subr.bf16.mxu1 %v1077_v10  ;;  %v872_v28 = vunpack.c.l.bf16 %v871_v24  ;;  %v873_v29 = vunpack.c.h.bf16 %v871_v24  ;;  %v885_v47 = vunpack.c.h.bf16 %v944_v43  ;;  %v884_v52 = vunpack.c.l.bf16 %v944_v43  ;;  %v945_v62 = vld [vmem:[#allocation8 + $0x20] sm:$0xff]  }
  0x3c   :  { %994 = vmatprep.subr.bf16.mxu0 %v1062_v3  ;;  %v437_v33 = vmul.f32 0.1, %v877_v27  ;;  %v436_v40 = vmul.f32 0.1, %v876_v30  ;;  %v438_v55 = vmul.f32 0.1, %v880_v46  ;;  %v889_v8 = vunpack.c.h.bf16 %v945_v62 }
  0x3d   :  { %v434_v34 = vmul.f32 0.1, %v872_v28  ;;  %v435_v35 = vmul.f32 0.1, %v873_v29  ;;  %v441_v57 = vmul.f32 0.1, %v885_v47 }
  0x3e   :  { %1025 = vmatpush3.bf16.msra.mxu1 %v1077_v10  ;;  %v439_v58 = vmul.f32 0.1, %v881_v48  ;;  %v440_v0 = vmul.f32 0.1, %v884_v52  ;;  %v948_v27 = vld [vmem:[#allocation8 + $0x38] sm:$0xff]  }
  0x3f   :  { %995 = vmatpush3.bf16.msra.mxu0 %v1062_v3  ;;  %1026 = vmatprep.subr.bf16.mxu1 %v1078_v12  ;;  %v946_v3 = vld [vmem:[#allocation8 + $0x28] sm:$0xff]  }
  0x40   :  { %996 = vmatprep.subr.bf16.mxu0 %v1063_v5  ;;  %v893_v7 = vunpack.c.h.bf16 %v946_v3 }
  0x42   :  { %1027 = vmatpush3.bf16.msra.mxu1 %v1078_v12  ;;  %v892_v12 = vunpack.c.l.bf16 %v946_v3 }
  0x43   :  { %997 = vmatpush3.bf16.msra.mxu0 %v1063_v5  ;;  %1028 = vmatprep.subr.bf16.mxu1 %v1079_v13 }
  0x44   :  { %998 = vmatprep.subr.bf16.mxu0 %v1064_v6  ;;  %v444_v24 = vmul.f32 0.1, %v892_v12 }
  0x46   :  { %1029 = vmatpush3.bf16.msra.mxu1 %v1079_v13 }
  0x47   :  { %999 = vmatpush3.bf16.msra.mxu0 %v1064_v6  ;;  %1030 = vmatprep.subr.bf16.mxu1 %v1080_v21  ;;  %v888_v6 = vunpack.c.l.bf16 %v945_v62 }
  0x48   :  { %1000 = vmatprep.subr.bf16.mxu0 %v1065_v9 }
  0x4a   :  { %1031 = vmatpush3.bf16.msra.mxu1 %v1080_v21 }
  0x4b   :  { %1001 = vmatpush3.bf16.msra.mxu0 %v1065_v9  ;;  %1032 = vmatprep.subr.bf16.mxu1 %v1081_v22 }
  0x4c   :  { %1002 = vmatprep.subr.bf16.mxu0 %v1066_v11 }
  0x4e   :  { %1033 = vmatpush3.bf16.msra.mxu1 %v1081_v22  ;;  %v947_v22 = vld [vmem:[#allocation8 + $0x30] sm:$0xff]  }
  0x4f   :  { %1003 = vmatpush3.bf16.msra.mxu0 %v1066_v11  ;;  %1034 = vmatprep.subr.bf16.mxu1 %v1082_v23  ;;  %v896_v30 = vunpack.c.l.bf16 %v947_v22 }
  0x52   :  { %1005 = vmatmul.mubr.bf16.vlgmr.msra.gmra.mxu0 %v1068_v14  ;;  %1035 = vmatpush3.bf16.msra.mxu1 %v1082_v23 }
  0x53   :  { %1008 = vmatprep.mubr.bf16.mxu0 %v1069_v15  ;;  %v442_v15 = vmul.f32 0.1, %v888_v6 }
  0x5a   :  { %1009 = vmatmul.mubr.bf16.gmra.mxu0 %v1070_v16 }
  0x5b   :  { %1012 = vmatprep.mubr.bf16.mxu0 %v1071_v17  ;;  %v445_v17 = vmul.f32 0.1, %v893_v7 }
  0x62   :  { %1013 = vmatmul.mubr.bf16.gmra.mxu0 %v1072_v18  ;;  %v443_v18 = vmul.f32 0.1, %v889_v8 }
  0x63   :  { %1016 = vmatprep.mubr.bf16.mxu0 %v1073_v19 }
  0x6a   :  { %1017 = vmatmul.mubr.bf16.gmra.mxu0 %v1074_v20 }
 0x112   :  { %v1006_v26 = vpop.f32.mrf.mxu0 }
 0x113   :  { %v388_v39 = vmul.f32 0.9, %v1006_v26 }
 0x114   :  { %v272_v31 = vpop.f32.mrf.mxu0 }
 0x115   :  { %v386_v36 = vmul.f32 0.9, %v272_v31  ;;  %v1285_v51 = vadd.f32 %v436_v40, %v388_v39  ;;  %v901_v31 = vunpack.c.h.bf16 %v948_v27  ;;  %v446_v39 = vmul.f32 0.1, %v896_v30 }
 0x116   :  { %v1007_v32 = vpop.f32.mrf.mxu0 }
 0x117   :  { %v389_v37 = vmul.f32 0.9, %v1007_v32  ;;  %v1281_v49 = vadd.f32 %v434_v34, %v386_v36  ;;  %v897_v34 = vunpack.c.h.bf16 %v947_v22  ;;  %v900_v36 = vunpack.c.l.bf16 %v948_v27 }
 0x118   :  { %v275_v41 = vpop.f32.mrf.mxu0  ;;  %v653_v62 = vmul.f32 0.5945349, %v1285_v51 }
 0x119   :  { %v387_v42 = vmul.f32 0.9, %v275_v41  ;;  %v1279_v44 = vadd.f32 %v437_v33, %v389_v37  ;;  %v449_v41 = vmul.f32 0.1, %v901_v31  ;;  %v447_v46 = vmul.f32 0.1, %v897_v34 }
 0x11a   :  { %v1010_v45 = vpop.f32.mrf.mxu0  ;;  %v448_v48 = vmul.f32 0.1, %v900_v36 }
 0x11b   :  { %v1283_v50 = vadd.f32 %v435_v35, %v387_v42  ;;  %v467_v59 = vpack.c.bf16 %v1279_v44, %v1285_v51  ;;  %v392_v63 = vmul.f32 0.9, %v1010_v45  ;;  %v654_v7 = vmul.f32 0.5945349, %v1279_v44 }
 0x11c   :  { %v288_v53 = vpop.f32.mrf.mxu0 }
 0x11d   :  { %v466_v54 = vpack.c.bf16 %v1283_v50, %v1281_v49  ;;  %v390_v60 = vmul.f32 0.9, %v288_v53  ;;  %v1297_v11 = vadd.f32 %v440_v0, %v392_v63  ;;  %v651_v0 = vmul.f32 0.5945349, %v1281_v49 }
 0x11e   :  { %v1011_v56 = vpop.f32.mrf.mxu0  ;;  %v652_v12 = vmul.f32 0.5945349, %v1283_v50 }
 0x11f   :  { %v393_v61 = vmul.f32 0.9, %v1011_v56  ;;  %1036 = vmatprep.mubr.bf16.mxu1 %v466_v54  ;;  %v1293_v9 = vadd.f32 %v438_v55, %v390_v60  ;;  %v657_v49 = vmul.f32 0.5945349, %v1297_v11 }
 0x120   :  { %v291_v1 = vpop.f32.mrf.mxu0  ;;  %1037 = vmatmul.mubr.bf16.vlgmr.msra.gmra.mxu1 %v467_v59 }
 0x121   :  { %v391_v2 = vmul.f32 0.9, %v291_v1  ;;  %v1291_v4 = vadd.f32 %v441_v57, %v393_v61 }
 0x122   :  { %v1014_v5 = vpop.f32.mrf.mxu0 }
 0x123   :  { %v1295_v10 = vadd.f32 %v439_v58, %v391_v2  ;;  %v469_v19 = vpack.c.bf16 %v1291_v4, %v1297_v11  ;;  %v396_v23 = vmul.f32 0.9, %v1014_v5  ;;  %v658_v50 = vmul.f32 0.5945349, %v1291_v4 }
 0x124   :  { %v304_v13 = vpop.f32.mrf.mxu0 }
 0x125   :  { %v468_v14 = vpack.c.bf16 %v1295_v10, %v1293_v9  ;;  %v394_v20 = vmul.f32 0.9, %v304_v13  ;;  %v1309_v35 = vadd.f32 %v444_v24, %v396_v23 }
 0x126   :  { %v1015_v16 = vpop.f32.mrf.mxu0 }
 0x127   :  { %v397_v21 = vmul.f32 0.9, %v1015_v16  ;;  %1040 = vmatprep.mubr.bf16.mxu1 %v468_v14  ;;  %v1305_v32 = vadd.f32 %v442_v15, %v394_v20  ;;  %v655_v20 = vmul.f32 0.5945349, %v1293_v9  ;;  %v661_v30 = vmul.f32 0.5945349, %v1309_v35 }
 0x128   :  { %v307_v25 = vpop.f32.mrf.mxu0  ;;  %1041 = vmatmul.mubr.bf16.gmra.mxu1 %v469_v19 }
 0x129   :  { %v395_v26 = vmul.f32 0.9, %v307_v25  ;;  %v1303_v28 = vadd.f32 %v445_v17, %v397_v21  ;;  %v659_v4 = vmul.f32 0.5945349, %v1305_v32 }
 0x12a   :  { %v1018_v29 = vpop.f32.mrf.mxu0 }
 0x12b   :  { %v1307_v33 = vadd.f32 %v443_v18, %v395_v26  ;;  %v471_v42 = vpack.c.bf16 %v1303_v28, %v1309_v35  ;;  %v400_v47 = vmul.f32 0.9, %v1018_v29  ;;  %v656_v26 = vmul.f32 0.5945349, %v1295_v10 }
 0x12c   :  { %v320_v37 = vpop.f32.mrf.mxu0  ;;  %v662_v10 = vmul.f32 0.5945349, %v1303_v28 }
 0x12d   :  { %v470_v38 = vpack.c.bf16 %v1307_v33, %v1305_v32  ;;  %v398_v43 = vmul.f32 0.9, %v320_v37  ;;  %v1321_v57 = vadd.f32 %v448_v48, %v400_v47 }
 0x12e   :  { %v1019_v40 = vpop.f32.mrf.mxu0 }
 0x12f   :  { %v401_v45 = vmul.f32 0.9, %v1019_v40  ;;  %1044 = vmatprep.mubr.bf16.mxu1 %v470_v38  ;;  %v1317_v55 = vadd.f32 %v446_v39, %v398_v43  ;;  %v665_v28 = vmul.f32 0.5945349, %v1321_v57 }
 0x130   :  { %v323_v52 = vpop.f32.mrf.mxu0  ;;  %1045 = vmatmul.mubr.bf16.gmra.mxu1 %v471_v42 }
 0x131   :  { %v399_v53 = vmul.f32 0.9, %v323_v52  ;;  %v1315_v54 = vadd.f32 %v449_v41, %v401_v45  ;;  %v660_v45 = vmul.f32 0.5945349, %v1307_v33 }
 0x133   :  { %v1319_v56 = vadd.f32 %v447_v46, %v399_v53  ;;  %v473_v59 = vpack.c.bf16 %v1315_v54, %v1321_v57 }
 0x135   :  { %v472_v58 = vpack.c.bf16 %v1319_v56, %v1317_v55  ;;  %v664_v57 = vmul.f32 0.5945349, %v1319_v56 }
 0x137   :  { %1048 = vmatprep.mubr.bf16.mxu1 %v472_v58 }
 0x138   :  { %1049 = vmatmul.mubr.bf16.gmra.mxu1 %v473_v59 }
 0x1e0   :  { %v1038_v60 = vpop.f32.mrf.mxu1 }
 0x1e1   :  { %v637_v61 = vmul.f32 0.4054651, %v1038_v60 }
 0x1e2   :  { %v572_v63 = vpop.f32.mrf.mxu1 }
 0x1e3   :  { %v669_v1 = vadd.f32 %v653_v62, %v637_v61  ;;  %v635_v2 = vmul.f32 0.4054651, %v572_v63 }
 0x1e4   :  { %v1039_v3 = vpop.f32.mrf.mxu1 }
 0x1e5   :  { %v667_v5 = vadd.f32 %v651_v0, %v635_v2  ;;  %v638_v6 = vmul.f32 0.4054651, %v1039_v3  ;;  %1083 = vtanh.f32 %v669_v1  ;;  %v663_v0 = vmul.f32 0.5945349, %v1317_v55 }
 0x1e6   :  { %v575_v8 = vpop.f32.mrf.mxu1 }
 0x1e7   :  { %v670_v13 = vadd.f32 %v654_v7, %v638_v6  ;;  %v636_v14 = vmul.f32 0.4054651, %v575_v8  ;;  %1085 = vtanh.f32 %v667_v5  ;;  %v666_v7 = vmul.f32 0.5945349, %v1315_v54 }
 0x1e8   :  { %v1042_v15 = vpop.f32.mrf.mxu1 }
 0x1e9   :  { %1087 = vtanh.f32 %v670_v13  ;;  %v668_v51 = vadd.f32 %v652_v12, %v636_v14  ;;  %v641_v16 = vmul.f32 0.4054651, %v1042_v15 }
 0x1ea   :  { %v588_v17 = vpop.f32.mrf.mxu1 }
 0x1eb   :  { %1089 = vtanh.f32 %v668_v51  ;;  %v673_v18 = vadd.f32 %v657_v49, %v641_v16  ;;  %v639_v19 = vmul.f32 0.4054651, %v588_v17 }
 0x1ec   :  { %v1043_v44 = vpop.f32.mrf.mxu1 }
 0x1ed   :  { %v671_v21 = vadd.f32 %v655_v20, %v639_v19  ;;  %v642_v22 = vmul.f32 0.4054651, %v1043_v44  ;;  %1091 = vtanh.f32 %v673_v18 }
 0x1ee   :  { %v591_v23 = vpop.f32.mrf.mxu1 }
 0x1ef   :  { %v674_v24 = vadd.f32 %v658_v50, %v642_v22  ;;  %v640_v25 = vmul.f32 0.4054651, %v591_v23  ;;  %1093 = vtanh.f32 %v671_v21 }
 0x1f0   :  { %v1046_v27 = vpop.f32.mrf.mxu1 }
 0x1f1   :  { %1095 = vtanh.f32 %v674_v24  ;;  %v672_v11 = vadd.f32 %v656_v26, %v640_v25  ;;  %v645_v29 = vmul.f32 0.4054651, %v1046_v27 }
 0x1f2   :  { %v604_v31 = vpop.f32.mrf.mxu1  ;;  %v1084_v9 = vpop.eup %1083 }
 0x1f3   :  { %1097 = vtanh.f32 %v672_v11  ;;  %v677_v34 = vadd.f32 %v661_v30, %v645_v29  ;;  %v643_v36 = vmul.f32 0.4054651, %v604_v31  ;;  %v701_v42 = vmax.f32 %v1084_v9, 0.0 }
 0x1f4   :  { %v1047_v37 = vpop.f32.mrf.mxu1  ;;  %v1086_v38 = vpop.eup %1085 }
 0x1f5   :  { %v675_v39 = vadd.f32 %v659_v4, %v643_v36  ;;  %v646_v40 = vmul.f32 0.4054651, %v1047_v37  ;;  %1099 = vtanh.f32 %v677_v34  ;;  %v699_v52 = vmax.f32 %v1086_v38, 0.0 }
 0x1f6   :  { %v1088_v41 = vpop.eup %1087  ;;  %v607_v43 = vpop.f32.mrf.mxu1 }
 0x1f7   :  { %v702_v46 = vmax.f32 %v1088_v41, 0.0  ;;  %v678_v35 = vadd.f32 %v662_v10, %v646_v40  ;;  %v644_v47 = vmul.f32 0.4054651, %v607_v43  ;;  %1101 = vtanh.f32 %v675_v39 }
 0x1f8   :  { %v1090_v48 = vpop.eup %1089  ;;  %v1050_v53 = vpop.f32.mrf.mxu1 }
 0x1f9   :  { %v910_v32 = vpack.c.bf16 %v702_v46, %v701_v42  ;;  %v700_v58 = vmax.f32 %v1090_v48, 0.0  ;;  %1103 = vtanh.f32 %v678_v35  ;;  %v676_v59 = vadd.f32 %v660_v45, %v644_v47 }
 0x1fa   :  { %v649_v60 = vmul.f32 0.4054651, %v1050_v53  ;;  %v620_v61 = vpop.f32.mrf.mxu1  ;;  %v1092_v62 = vpop.eup %1091 }
 0x1fb   :  { %949 = vst [vmem:[#allocation11 + $0x8] sm:$0xff] %v910_v32   ;;  %v905_v63 = vpack.c.bf16 %v700_v58, %v699_v52  ;;  %1105 = vtanh.f32 %v676_v59  ;;  %v647_v33 = vmul.f32 0.4054651, %v620_v61  ;;  %v705_v12 = vmax.f32 %v1092_v62, 0.0 }
 0x1fc   :  { %v681_v1 = vadd.f32 %v665_v28, %v649_v60  ;;  %v1051_v2 = vpop.f32.mrf.mxu1  ;;  %v1094_v3 = vpop.eup %1093 }
 0x1fd   :  { %906 = vst [vmem:[#allocation11] sm:$0xff] %v905_v63   ;;  %v679_v5 = vadd.f32 %v663_v0, %v647_v33  ;;  %v650_v6 = vmul.f32 0.4054651, %v1051_v2  ;;  %v703_v49 = vmax.f32 %v1094_v3, 0.0 }
 0x1fe   :  { %v1096_v8 = vpop.eup %1095  ;;  %v623_v13 = vpop.f32.mrf.mxu1  ;;  %1107 = vtanh.f32 %v681_v1 }
 0x1ff   :  { %v706_v14 = vmax.f32 %v1096_v8, 0.0  ;;  %v682_v15 = vadd.f32 %v666_v7, %v650_v6  ;;  %v648_v51 = vmul.f32 0.4054651, %v623_v13  ;;  %1109 = vtanh.f32 %v679_v5 }
 0x200   :  { %v1098_v16 = vpop.eup %1097 }
 0x201   :  { %v920_v55 = vpack.c.bf16 %v706_v14, %v705_v12  ;;  %v704_v17 = vmax.f32 %v1098_v16, 0.0  ;;  %1111 = vtanh.f32 %v682_v15  ;;  %v680_v18 = vadd.f32 %v664_v57, %v648_v51 }
 0x202   :  { %v1100_v54 = vpop.eup %1099 }
 0x203   :  { %951 = vst [vmem:[#allocation11 + $0x18] sm:$0xff] %v920_v55   ;;  %v915_v19 = vpack.c.bf16 %v704_v17, %v703_v49  ;;  %1113 = vtanh.f32 %v680_v18  ;;  %v709_v21 = vmax.f32 %v1100_v54, 0.0 }
 0x204   :  { %v1102_v20 = vpop.eup %1101 }
 0x205   :  { %950 = vst [vmem:[#allocation11 + $0x10] sm:$0xff] %v915_v19   ;;  %v707_v50 = vmax.f32 %v1102_v20, 0.0 }
 0x206   :  { %v1104_v44 = vpop.eup %1103 }
 0x207   :  { %v710_v56 = vmax.f32 %v1104_v44, 0.0 }
 0x208   :  { %v1106_v22 = vpop.eup %1105 }
 0x209   :  { %v930_v23 = vpack.c.bf16 %v710_v56, %v709_v21  ;;  %v708_v24 = vmax.f32 %v1106_v22, 0.0 }
 0x20b   :  { %953 = vst [vmem:[#allocation11 + $0x28] sm:$0xff] %v930_v23   ;;  %v925_v25 = vpack.c.bf16 %v708_v24, %v707_v50  ;;  %v1108_v26 = vpop.eup %1107 }
 0x20c   :  { %v1110_v27 = vpop.eup %1109  ;;  %v713_v29 = vmax.f32 %v1108_v26, 0.0 }
 0x20d   :  { %952 = vst [vmem:[#allocation11 + $0x20] sm:$0xff] %v925_v25   ;;  %v711_v9 = vmax.f32 %v1110_v27, 0.0 }
 0x20e   :  { %v1112_v11 = vpop.eup %1111 }
 0x20f   :  { %v714_v30 = vmax.f32 %v1112_v11, 0.0 }
 0x210   :  { %v1114_v31 = vpop.eup %1113 }
 0x211   :  { %v940_v34 = vpack.c.bf16 %v714_v30, %v713_v29  ;;  %v712_v36 = vmax.f32 %v1114_v31, 0.0 }
 0x213   :  { %955 = vst [vmem:[#allocation11 + $0x38] sm:$0xff] %v940_v34   ;;  %v935_v4 = vpack.c.bf16 %v712_v36, %v711_v9 }
 0x215   :  { %954 = vst [vmem:[#allocation11 + $0x30] sm:$0xff] %v935_v4  }
 0x216   :  { %1206 = shalt.err (!%p1203_p10)
}
 0x217   :  { %806 = dma.vmem_to_hbm [thread:$0]  %s801_s3, 1024, %s1353_s4, [#allocation5], %s1225_s20, %s1225_s20, %s1226_s21  }
 0x218   :  { %1221 = dma.done.wait [#allocation5], 1024  }
 0x219   :  { %1222 = vsyncadd [#allocation5], 4294966272 }
 0x21a   :  { %810 = vsyncpa [#allocation4], 1 }
 0x21b   :  { %811 = vsyncpa [#allocation7], 1 }
 0x21c   :  { %812 = vsyncpa [#allocation10], 1 }
 0x21d   :  { %813 = vsyncpa [#allocation5], 1 }

</bundles_post_ra>
